<compile_context>
chip_gen: v6e
topology: v6e:2x2x1
jax: 0.10.0
libtpu: 0.0.40
codegen_flags: <defaults>
</compile_context>

<pallas_src>
import jax
import jax.numpy as jnp
from jax.experimental import pallas as pl
from jax.experimental.pallas import tpu as pltpu

_BN_EPS = 1e-5
_VMEM_LIMIT = 40 * 1024 * 1024


def _round_up(v, m):
    return (v + m - 1) // m * m


# ---------------------------------------------------------------------------
# Tile plan
# ---------------------------------------------------------------------------
def _tile_plan(n):
    """Return (n_pad, tn, tk): padded node count, row (target) tile, column
    (source) tile.  Rows and columns share one padded extent so the bf16
    activation array can serve both the target and the source role across
    layers."""
    n8 = _round_up(max(int(n), 1), 8)
    if n8 <= 64:
        # tiny graph: a single full-extent block; DMA traffic is negligible.
        return n8, n8, n8
    if n8 <= 4096:
        # two row blocks (both v7x TensorCores get work on the "parallel"
        # axis); tn is a multiple of 32 so int8/bf16 tiles stay layout-native.
        # Padding overhead is at most ~63 rows (vs. rounding N^2 to 256/512
        # multiples).  Whole source axis kept as one column tile: worst case
        # (n_pad=4096) per-step VMEM ~17 MiB << 40 MiB limit.
        tn = _round_up(pl.cdiv(n8, 2), 32)
        return 2 * tn, tn, 2 * tn
    # large graphs: fixed (256 x 512) adjacency tiles -> per-step VMEM is
    # independent of graph size; the K axis becomes a real reduction loop.
    n_pad = _round_up(n8, 512)
    return n_pad, 256, 512


# ---------------------------------------------------------------------------
# Kernels
# ---------------------------------------------------------------------------
def _make_conv_kernel(has_w1):
    """One GINConv layer, K-tiled over source nodes.

    adj[i, j] = #edges j -> i (target-major, int8, cast to bf16 in-kernel).
    GINConv (eps = 0): nn(x_i + sum_{j in N(i)} x_j),
    nn = Linear -> BatchNorm1d(eval, folded into W1/b1) -> ReLU -> Linear -> ReLU.
    For layer 1 (has_w1=False) the first Linear is pre-applied to x outside
    the kernel (exact by linearity of the sum), so the MLP starts at +b1.
    """
    def kernel(x_row_ref, x_src_ref, adj_ref, *rest):
        if has_w1:
            w1_ref, b1_ref, w2_ref, b2_ref, out_ref, acc_ref = rest
        else:
            b1_ref, w2_ref, b2_ref, out_ref, acc_ref = rest

        k = pl.program_id(1)

        @pl.when(k == 0)
        def _init():
            acc_ref[...] = jnp.zeros_like(acc_ref)

        # neighbour sum over this source tile (bf16 MXU inputs, f32 accumulate)
        adj_bf16 = adj_ref[...].astype(jnp.bfloat16)
        acc_ref[...] += jnp.dot(adj_bf16, x_src_ref[...],
                                preferred_element_type=jnp.float32)

        @pl.when(k == pl.num_programs(1) - 1)
        def _epilogue():
            # (1 + eps) * x_i + sum_j x_j   (eps = 0)
            z = acc_ref[...] + x_row_ref[...].astype(jnp.float32)
            if has_w1:
                y = jnp.dot(z.astype(jnp.bfloat16), w1_ref[...],
                            preferred_element_type=jnp.float32)
            else:
                y = z                       # Linear1 (BN-folded) pre-applied
            # TODO(synk): training-mode BatchNorm (batch statistics) not implemented.
            y = jnp.maximum(y + b1_ref[...], 0.0)
            y = jnp.dot(y.astype(jnp.bfloat16), w2_ref[...],
                        preferred_element_type=jnp.float32) + b2_ref[...]
            out_ref[...] = jnp.maximum(y, 0.0).astype(out_ref.dtype)

    return kernel


def _pool_linear_kernel(pool_ref, h_ref, wlin_ref, blin_ref, out_ref, acc_ref):
    """global_add_pool (0/1 matmul, tiled over nodes) + final Linear."""
    k = pl.program_id(0)

    @pl.when(k == 0)
    def _init():
        acc_ref[...] = jnp.zeros_like(acc_ref)

    acc_ref[...] += jnp.dot(pool_ref[...], h_ref[...],
                            preferred_element_type=jnp.float32)

    @pl.when(k == pl.num_programs(0) - 1)
    def _finalize():
        # TODO(synk): dropout(p=0.5) is identity in eval mode; training dropout omitted.
        out_ref[...] = jnp.dot(acc_ref[...].astype(jnp.bfloat16), wlin_ref[...],
                               preferred_element_type=jnp.float32) + blin_ref[...]


# ---------------------------------------------------------------------------
# pallas_call wrappers
# ---------------------------------------------------------------------------
def _conv_layer(h, adj, lp, plan, *, has_w1):
    n_pad, tn, tk = plan
    d_src = h.shape[1]
    hdim = lp["w2"].shape[0]

    in_specs = [
        # self-term tile (index (i, 0): DMA'd once per row block, not per k)
        pl.BlockSpec((tn, d_src), lambda i, k: (i, 0)),
        # source-node tile for this k step (bf16 activations)
        pl.BlockSpec((tk, d_src), lambda i, k: (k, 0)),
        # adjacency tile (int8)
        pl.BlockSpec((tn, tk), lambda i, k: (i, k)),
    ]
    args = [h, h, adj]
    if has_w1:
        in_specs.append(pl.BlockSpec((d_src, hdim), lambda i, k: (0, 0)))
        args.append(lp["w1"])
    in_specs += [
        pl.BlockSpec((1, hdim), lambda i, k: (0, 0)),      # b1 (BN folded)
        pl.BlockSpec((hdim, hdim), lambda i, k: (0, 0)),   # W2 (bf16)
        pl.BlockSpec((1, hdim), lambda i, k: (0, 0)),      # b2
    ]
    args += [lp["b1"], lp["w2"], lp["b2"]]

    return pl.pallas_call(
        _make_conv_kernel(has_w1),
        out_shape=jax.ShapeDtypeStruct((n_pad, hdim), jnp.bfloat16),
        grid=(n_pad // tn, n_pad // tk),
        in_specs=in_specs,
        out_specs=pl.BlockSpec((tn, hdim), lambda i, k: (i, 0)),
        scratch_shapes=[pltpu.VMEM((tn, hdim), jnp.float32)],
        compiler_params=pltpu.CompilerParams(
            dimension_semantics=("parallel", "arbitrary"),
            vmem_limit_bytes=_VMEM_LIMIT),
    )(*args)


def _pool_linear(h, pool, wlin, blin, plan):
    n_pad, _, tk = plan
    g = pool.shape[0]
    hdim = h.shape[1]
    oc = wlin.shape[1]
    return pl.pallas_call(
        _pool_linear_kernel,
        out_shape=jax.ShapeDtypeStruct((g, oc), jnp.float32),
        grid=(n_pad // tk,),
        in_specs=[
            pl.BlockSpec((g, tk), lambda k: (0, k)),
            pl.BlockSpec((tk, hdim), lambda k: (k, 0)),
            pl.BlockSpec((hdim, oc), lambda k: (0, 0)),
            pl.BlockSpec((1, oc), lambda k: (0, 0)),
        ],
        out_specs=pl.BlockSpec((g, oc), lambda k: (0, 0)),
        scratch_shapes=[pltpu.VMEM((g, hdim), jnp.float32)],
        compiler_params=pltpu.CompilerParams(
            dimension_semantics=("arbitrary",),
            vmem_limit_bytes=_VMEM_LIMIT),
    )(pool, h, wlin, blin)


def _prepare_kernel_params(params):
    """Fold BatchNorm (eval) into W1/b1 and cast matmul weights to bf16."""
    kp = {"convs": []}
    for c in params["convs"]:
        scale = c["gamma"] / jnp.sqrt(c["var"] + _BN_EPS)      # (1, H) f32
        shift = c["beta"] - c["mean"] * scale
        kp["convs"].append(dict(
            w1=(c["w1"] * scale).astype(jnp.bfloat16),         # BN scale folded
            b1=c["b1"] * scale + shift,                        # BN shift folded (f32)
            w2=c["w2"].astype(jnp.bfloat16),
            b2=c["b2"]))
    kp["wlin"] = params["wlin"].astype(jnp.bfloat16)
    kp["blin"] = params["blin"]
    return kp


def gin_forward(x, edge_index, batch, params, *, num_graphs):
    n = x.shape[0]
    src, dst = edge_index[0], edge_index[1]
    plan = _tile_plan(n)
    n_pad, _, _ = plan

    # Dense adjacency, 1 byte/entry in HBM (cast to bf16 in-kernel).
    # .add (not .set) keeps PyG's per-edge sum semantics for duplicate edges.
    # (int8 would overflow for >127 parallel edges between a single pair.)
    adj = (jnp.zeros((n_pad, n_pad), jnp.int32)
           .at[dst, src].add(1).astype(jnp.int8))
    # Padded rows/columns stay zero, so padded nodes never feed real nodes and
    # have zero pooling weight; garbage in padded output rows is harmless.

    kp = _prepare_kernel_params(params)

    # Layer 1: pre-project node features with the BN-folded first Linear
    # outside the kernel (exact by linearity of GIN's sum); aggregate in the
    # hidden width instead of the lane-sparse in_channels width.
    u = jnp.dot(x.astype(jnp.bfloat16), kp["convs"][0]["w1"],
                preferred_element_type=jnp.float32)
    h = jnp.zeros((n_pad, u.shape[1]), jnp.bfloat16).at[:n].set(
        u.astype(jnp.bfloat16))

    h = _conv_layer(h, adj, kp["convs"][0], plan, has_w1=False)
    h = _conv_layer(h, adj, kp["convs"][1], plan, has_w1=True)
    h = _conv_layer(h, adj, kp["convs"][2], plan, has_w1=True)

    onehot = (batch[None, :] == jnp.arange(num_graphs)[:, None])
    pool = jnp.zeros((num_graphs, n_pad), jnp.bfloat16).at[:, :n].set(
        onehot.astype(jnp.bfloat16))
    return _pool_linear(h, pool, kp["wlin"], kp["blin"], plan)


# ---------------------------------------------------------------------------
# Deterministic parameter init (shapes as in the PyTorch module, eval mode)
# ---------------------------------------------------------------------------
def init_params(key, in_channels, hidden_channels, out_channels=1):
    keys = iter(jax.random.split(key, 64))

    def w(fi, fo):
        return jax.random.normal(next(keys), (fi, fo), jnp.float32) / jnp.sqrt(float(fi))

    def b(fo):
        return 0.1 * jax.random.normal(next(keys), (1, fo), jnp.float32)

    convs = []
    d = in_channels
    for _ in range(3):
        convs.append(dict(
            w1=w(d, hidden_channels), b1=b(hidden_channels),
            gamma=1.0 + 0.1 * jax.random.normal(next(keys), (1, hidden_channels), jnp.float32),
            beta=0.1 * jax.random.normal(next(keys), (1, hidden_channels), jnp.float32),
            mean=0.1 * jax.random.normal(next(keys), (1, hidden_channels), jnp.float32),
            var=1.0 + 0.1 * jnp.abs(jax.random.normal(next(keys), (1, hidden_channels), jnp.float32)),
            w2=w(hidden_channels, hidden_channels), b2=b(hidden_channels)))
        d = hidden_channels
    return dict(convs=convs,
                wlin=w(hidden_channels, out_channels),
                blin=b(out_channels))


# ---------------------------------------------------------------------------
# Pure-JAX dense reference.  Matmul operands are cast to bf16 to match the
# kernel's MXU input precision (f32 accumulation); BN is applied unfolded.
# ---------------------------------------------------------------------------
def reference_forward(x, edge_index, batch, params, *, num_graphs):
    n = x.shape[0]
    src, dst = edge_index[0], edge_index[1]
    adj = jnp.zeros((n, n), jnp.float32).at[dst, src].add(1.0)

    def mm(a, b):
        return jnp.dot(a.astype(jnp.bfloat16), b.astype(jnp.bfloat16),
                       preferred_element_type=jnp.float32)

    h = x.astype(jnp.float32)
    for c in params["convs"]:
        z = h + mm(adj, h)                                   # GINConv, eps = 0
        y = mm(z, c["w1"]) + c["b1"]
        y = (y - c["mean"]) / jnp.sqrt(c["var"] + _BN_EPS) * c["gamma"] + c["beta"]
        y = jax.nn.relu(y)
        y = jax.nn.relu(mm(y, c["w2"]) + c["b2"])
        h = y                                                # outer .relu() is idempotent

    onehot = (batch[None, :] == jnp.arange(num_graphs)[:, None]).astype(jnp.float32)
    pooled = mm(onehot, h)                                   # global_add_pool
    return mm(pooled, params["wlin"]) + params["blin"]       # dropout(eval) = identity


# ---------------------------------------------------------------------------
# Test helpers
# ---------------------------------------------------------------------------
def _ring_graphs(sizes):
    """Batched bidirectional ring graphs; returns (edge_index, batch)."""
    srcs, dsts, batch = [], [], []
    start = 0
    for g, s in enumerate(sizes):
        idx = jnp.arange(s, dtype=jnp.int32) + start
        nxt = jnp.roll(idx, -1)
        srcs += [idx, nxt]
        dsts += [nxt, idx]
        batch.append(jnp.full((s,), g, jnp.int32))
        start += s
    edge_index = jnp.stack([jnp.concatenate(srcs), jnp.concatenate(dsts)])
    return edge_index, jnp.concatenate(batch)


if __name__ == "__main__":
    key = jax.random.PRNGKey(0)
    in_channels, hidden_channels, out_channels = 4, 32, 1
    kx1, kx2, kp = jax.random.split(key, 3)
    params = init_params(kp, in_channels, hidden_channels, out_channels)

    # Test 1: tiny graph (single-block path): two 4-node rings.
    sizes1 = [4, 4]
    x1 = jax.random.normal(kx1, (sum(sizes1), in_channels), jnp.float32)
    ei1, b1 = _ring_graphs(sizes1)
    out1 = jax.block_until_ready(
        gin_forward(x1, ei1, b1, params, num_graphs=len(sizes1)))
    ref1 = reference_forward(x1, ei1, b1, params, num_graphs=len(sizes1))
    assert out1.shape == (len(sizes1), out_channels), out1.shape
    assert jnp.allclose(out1, ref1, atol=2e-2, rtol=2e-2), (out1, ref1)

    # Test 2: medium graph (tiled path: int8 adjacency tiles, two "parallel"
    # row blocks, padded rows/columns): three rings, 80 nodes total.
    sizes2 = [30, 26, 24]
    x2 = jax.random.normal(kx2, (sum(sizes2), in_channels), jnp.float32)
    ei2, b2 = _ring_graphs(sizes2)
    out2 = jax.block_until_ready(
        gin_forward(x2, ei2, b2, params, num_graphs=len(sizes2)))
    ref2 = reference_forward(x2, ei2, b2, params, num_graphs=len(sizes2))
    assert out2.shape == (len(sizes2), out_channels), out2.shape
    assert jnp.allclose(out2, ref2, atol=2e-2, rtol=2e-2), (out2, ref2)

    print("KERNEL_OK")
</pallas_src>

<mosaic_0001>
module attributes {stable_mosaic.version = 11 : i64} {
  func.func @kernel(%arg0: i32, %arg1: i32, %arg2: memref<8x32xbf16, #tpu.memory_space<vmem>>, %arg3: memref<8x32xbf16, #tpu.memory_space<vmem>>, %arg4: memref<8x8xi8, #tpu.memory_space<vmem>>, %arg5: memref<1x32xf32, #tpu.memory_space<vmem>>, %arg6: memref<32x32xbf16, #tpu.memory_space<vmem>>, %arg7: memref<1x32xf32, #tpu.memory_space<vmem>>, %arg8: memref<8x32xbf16, #tpu.memory_space<vmem>>, %arg9: memref<8x32xf32, #tpu.memory_space<vmem>>) attributes {dimension_semantics = [#tpu.dimension_semantics<parallel>, #tpu.dimension_semantics<arbitrary>], iteration_bounds = array<i64: 1, 1>, scalar_prefetch = 0 : i64, scratch_operands = 1 : i64, tpu.core_type = #tpu.core_type<tc>, window_params = [{transform_indices = @transform_0, window_bounds = array<i64: 8, 32>}, {transform_indices = @transform_1, window_bounds = array<i64: 8, 32>}, {transform_indices = @transform_2, window_bounds = array<i64: 8, 8>}, {pipeline_mode = #tpu.pipeline_mode<synchronous>, transform_indices = @transform_3, window_bounds = array<i64: 1, 32>}, {pipeline_mode = #tpu.pipeline_mode<synchronous>, transform_indices = @transform_4, window_bounds = array<i64: 32, 32>}, {pipeline_mode = #tpu.pipeline_mode<synchronous>, transform_indices = @transform_5, window_bounds = array<i64: 1, 32>}, {transform_indices = @transform_6, window_bounds = array<i64: 8, 32>}]} {
    %c0_i32 = arith.constant 0 : i32
    %0 = arith.cmpi eq, %arg1, %c0_i32 : i32
    %1 = arith.extui %0 : i1 to i32
    %c0_i32_0 = arith.constant 0 : i32
    %2 = arith.cmpi ne, %1, %c0_i32_0 : i32
    scf.if %2 {
      %cst_10 = arith.constant 0.000000e+00 : f32
      %13 = vector.broadcast %cst_10 : f32 to vector<8x32xf32>
      %c0_11 = arith.constant 0 : index
      %c0_12 = arith.constant 0 : index
      %14 = vector.load %arg9[%c0_11, %c0_12] : memref<8x32xf32, #tpu.memory_space<vmem>>, vector<8x32xf32>
      tpu.vector_store %arg9[%c0_11, %c0_12], %13 {strides = array<i32>} : memref<8x32xf32, #tpu.memory_space<vmem>>, vector<8x32xf32>,
    } else {
    }
    %c0 = arith.constant 0 : index
    %c0_1 = arith.constant 0 : index
    %3 = vector.load %arg4[%c0, %c0_1] : memref<8x8xi8, #tpu.memory_space<vmem>>, vector<8x8xi8>
    %4 = arith.sitofp %3 : vector<8x8xi8> to vector<8x8xbf16>
    %c0_2 = arith.constant 0 : index
    %c0_3 = arith.constant 0 : index
    %5 = vector.load %arg9[%c0_2, %c0_3] : memref<8x32xf32, #tpu.memory_space<vmem>>, vector<8x32xf32>
    %c0_4 = arith.constant 0 : index
    %c0_5 = arith.constant 0 : index
    %6 = vector.load %arg3[%c0_4, %c0_5] : memref<8x32xbf16, #tpu.memory_space<vmem>>, vector<8x32xbf16>
    %cst = arith.constant dense<0.000000e+00> : vector<8x32xf32>
    %7 = tpu.matmul %4, %6, %cst {dimension_numbers = #tpu.dot_dimension_numbers<[1], [0], [0], [1], [0, 0, 1, 1], [], []>} : vector<8x8xbf16>, vector<8x32xbf16>, vector<8x32xf32> -> vector<8x32xf32>
    %8 = arith.addf %5, %7 : vector<8x32xf32>
    %c0_6 = arith.constant 0 : index
    %c0_7 = arith.constant 0 : index
    %9 = vector.load %arg9[%c0_6, %c0_7] : memref<8x32xf32, #tpu.memory_space<vmem>>, vector<8x32xf32>
    tpu.vector_store %arg9[%c0_6, %c0_7], %8 {strides = array<i32>} : memref<8x32xf32, #tpu.memory_space<vmem>>, vector<8x32xf32>,
    %c0_i32_8 = arith.constant 0 : i32
    %10 = arith.cmpi eq, %arg1, %c0_i32_8 : i32
    %11 = arith.extui %10 : i1 to i32
    %c0_i32_9 = arith.constant 0 : i32
    %12 = arith.cmpi ne, %11, %c0_i32_9 : i32
    scf.if %12 {
      %c0_10 = arith.constant 0 : index
      %c0_11 = arith.constant 0 : index
      %13 = vector.load %arg9[%c0_10, %c0_11] : memref<8x32xf32, #tpu.memory_space<vmem>>, vector<8x32xf32>
      %c0_12 = arith.constant 0 : index
      %c0_13 = arith.constant 0 : index
      %14 = vector.load %arg2[%c0_12, %c0_13] : memref<8x32xbf16, #tpu.memory_space<vmem>>, vector<8x32xbf16>
      %15 = arith.extf %14 : vector<8x32xbf16> to vector<8x32xf32>
      %16 = arith.addf %13, %15 : vector<8x32xf32>
      %c0_14 = arith.constant 0 : index
      %c0_15 = arith.constant 0 : index
      %17 = vector.load %arg5[%c0_14, %c0_15] : memref<1x32xf32, #tpu.memory_space<vmem>>, vector<1x32xf32>
      %18 = vector.broadcast %17 : vector<1x32xf32> to vector<8x32xf32>
      %19 = arith.addf %16, %18 : vector<8x32xf32>
      %cst_16 = arith.constant 0.000000e+00 : f32
      %20 = vector.broadcast %cst_16 : f32 to vector<8x32xf32>
      %21 = arith.maximumf %19, %20 : vector<8x32xf32>
      %22 = arith.truncf %21 : vector<8x32xf32> to vector<8x32xbf16>
      %c0_17 = arith.constant 0 : index
      %c0_18 = arith.constant 0 : index
      %23 = vector.load %arg6[%c0_17, %c0_18] : memref<32x32xbf16, #tpu.memory_space<vmem>>, vector<32x32xbf16>
      %cst_19 = arith.constant dense<0.000000e+00> : vector<8x32xf32>
      %24 = tpu.matmul %22, %23, %cst_19 {dimension_numbers = #tpu.dot_dimension_numbers<[1], [0], [0], [1], [0, 0, 1, 1], [], []>} : vector<8x32xbf16>, vector<32x32xbf16>, vector<8x32xf32> -> vector<8x32xf32>
      %c0_20 = arith.constant 0 : index
      %c0_21 = arith.constant 0 : index
      %25 = vector.load %arg7[%c0_20, %c0_21] : memref<1x32xf32, #tpu.memory_space<vmem>>, vector<1x32xf32>
      %26 = vector.broadcast %25 : vector<1x32xf32> to vector<8x32xf32>
      %27 = arith.addf %24, %26 : vector<8x32xf32>
      %cst_22 = arith.constant 0.000000e+00 : f32
      %28 = vector.broadcast %cst_22 : f32 to vector<8x32xf32>
      %29 = arith.maximumf %27, %28 : vector<8x32xf32>
      %30 = arith.truncf %29 : vector<8x32xf32> to vector<8x32xbf16>
      %c0_23 = arith.constant 0 : index
      %c0_24 = arith.constant 0 : index
      %31 = vector.load %arg8[%c0_23, %c0_24] : memref<8x32xbf16, #tpu.memory_space<vmem>>, vector<8x32xbf16>
      tpu.vector_store %arg8[%c0_23, %c0_24], %30 {strides = array<i32>} : memref<8x32xbf16, #tpu.memory_space<vmem>>, vector<8x32xbf16>,
    } else {
    }
    return
  }
  func.func @transform_0(%arg0: i32, %arg1: i32) -> (i32, i32) {
    %c0_i32 = arith.constant 0 : i32
    %c0_i32_0 = arith.constant 0 : i32
    return %arg0, %c0_i32 : i32, i32
  }
  func.func @transform_1(%arg0: i32, %arg1: i32) -> (i32, i32) {
    %c0_i32 = arith.constant 0 : i32
    %c0_i32_0 = arith.constant 0 : i32
    return %arg1, %c0_i32 : i32, i32
  }
  func.func @transform_2(%arg0: i32, %arg1: i32) -> (i32, i32) {
    %c0_i32 = arith.constant 0 : i32
    return %arg0, %arg1 : i32, i32
  }
  func.func @transform_3(%arg0: i32, %arg1: i32) -> (i32, i32) {
    %c0_i32 = arith.constant 0 : i32
    %c0_i32_0 = arith.constant 0 : i32
    %c0_i32_1 = arith.constant 0 : i32
    return %c0_i32, %c0_i32_0 : i32, i32
  }
  func.func @transform_4(%arg0: i32, %arg1: i32) -> (i32, i32) {
    %c0_i32 = arith.constant 0 : i32
    %c0_i32_0 = arith.constant 0 : i32
    %c0_i32_1 = arith.constant 0 : i32
    return %c0_i32, %c0_i32_0 : i32, i32
  }
  func.func @transform_5(%arg0: i32, %arg1: i32) -> (i32, i32) {
    %c0_i32 = arith.constant 0 : i32
    %c0_i32_0 = arith.constant 0 : i32
    %c0_i32_1 = arith.constant 0 : i32
    return %c0_i32, %c0_i32_0 : i32, i32
  }
  func.func @transform_6(%arg0: i32, %arg1: i32) -> (i32, i32) {
    %c0_i32 = arith.constant 0 : i32
    %c0_i32_0 = arith.constant 0 : i32
    return %arg0, %c0_i32 : i32, i32
  }
}

</mosaic_0001>

<bundles_post_ra>
// kernel: tpu_custom_call.1
= control target key start
LH: loop header
LB: loop body
LE: loop exit
PB: predicated region body
PF: predicated region fallthrough
CT: control target
= control target key end

     0   :  { %11 = vsyncpa [#allocation4], 0  ;;  %s414_s0 = inlined_call_operand.hbm [shape: bf16[8,32], index: 0, kind: input, shape index: {}]   ;;  %s415_s1 = inlined_call_operand.hbm [shape: bf16[8,32], index: 1, kind: input, shape index: {}]   ;;  %s416_s2 = inlined_call_operand.vmem [shape: s8[8,8], index: 2, kind: input, shape index: {}]   ;;  %s417_s3 = inlined_call_operand.vmem [shape: f32[1,32], index: 3, kind: input, shape index: {}]   ;;  %s418_s4 = inlined_call_operand.hbm [shape: bf16[32,32], index: 4, kind: input, shape index: {}]   ;;  %s419_s5 = inlined_call_operand.vmem [shape: f32[1,32], index: 5, kind: input, shape index: {}]   ;;  %s420_s6 = inlined_call_operand.hbm [shape: bf16[8,32], index: 6, kind: output, shape index: {}]  }
   0x1   :  { %12 = vsyncpa [#allocation7], 0 }
   0x2   :  { %13 = vsyncpa [#allocation5], 0  ;;  %s347_s21 = smov [#allocation6]   ;;  %s348_s23 = smov [#allocation3]  }
   0x3   :  { %s30_s22 = sshll.u32 %s347_s21, 4  ;;  %s20_s24 = sshll.u32 %s348_s23, 4  ;;  %s31_s22 = int_to_ptr.vmem [resolvable:$true] %s30_s22  ;;  %s21_s24 = int_to_ptr.vmem [resolvable:$true] %s20_s24 }
   0x4   :  { %s269_s25 = scalar_lea.vmem %s31_s22, 64  ;;  %p274_p1 = scmp.lt.s32.totalorder %s31_s22, %s31_s22 }
   0x5   :  { %p270_p0 = scmp.ne.s32.totalorder %s31_s22, %s269_s25  ;;  %p275_p2 = scmp.lt.s32.totalorder %s269_s25, %s269_s25 }
   0x7   :  { %p276_p3 = por %p275_p2, %p274_p1 }
   0x9   :  { %p277_p4 = pnand %p276_p3, %p270_p0 }
   0xb   :  { %280 = shalt.err (!%p277_p4)
}
   0xc   :  { %33 = dma.hbm_to_vmem [thread:$0]  %s415_s1, 64, %s31_s22, [#allocation7]  }
   0xd   :  { %s289_s28 = scalar_lea.vmem %s21_s24, 64  ;;  %p294_p6 = scmp.lt.s32.totalorder %s21_s24, %s21_s24 }
   0xe   :  { %p290_p5 = scmp.ne.s32.totalorder %s21_s24, %s289_s28  ;;  %p295_p7 = scmp.lt.s32.totalorder %s289_s28, %s289_s28 }
  0x10   :  { %p296_p8 = por %p295_p7, %p294_p6 }
  0x12   :  { %p297_p9 = pnand %p296_p8, %p290_p5 }
  0x14   :  { %300 = shalt.err (!%p297_p9)
}
  0x15   :  { %23 = dma.hbm_to_vmem [thread:$0]  %s414_s0, 64, %s21_s24, [#allocation4]  }
  0x16   :  { %s349_s7 = smov [#allocation8]  }
  0x17   :  { %s43_s8 = sshll.u32 %s349_s7, 4  ;;  %s44_s8 = int_to_ptr.vmem [resolvable:$true] %s43_s8 }
  0x18   :  { %s309_s9 = scalar_lea.vmem %s44_s8, 256  ;;  %p314_p11 = scmp.lt.s32.totalorder %s44_s8, %s44_s8 }
  0x19   :  { %p310_p10 = scmp.ne.s32.totalorder %s44_s8, %s309_s9  ;;  %p315_p12 = scmp.lt.s32.totalorder %s309_s9, %s309_s9 }
  0x1b   :  { %p316_p13 = por %p315_p12, %p314_p11 }
  0x1d   :  { %p317_p0 = pnand %p316_p13, %p310_p10 }
  0x1f   :  { %320 = shalt.err (!%p317_p0)
}
  0x20   :  { %s350_s1 = smov 64   ;;  %s351_s10 = smov 4  }
  0x21   :  { %49 = dma.hbm_to_vmem [thread:$0]  %s418_s4, 256, %s44_s8, [#allocation7], %s350_s1, %s350_s1, %s351_s10  }
  0x22   :  { %341 = dma.done.wait [#allocation4], 64  }
  0x23   :  { %342 = vsyncadd [#allocation4], 4294967232 }
  0x24   :  { %343 = dma.done.wait [#allocation7], 320  }
  0x25   :  { %344 = vsyncadd [#allocation7], 4294966976  ;;  %v352_v0 = vmov 0.0   ;;  %vm353_vm0 = vmmov 0   ;;  %vm66_vm1 = vcmask 261120   ;;  %vm76_vm2 = vcmask 1043456  }
  0x26   :  { %237 = vmatprep.subr.bf16.mxu0 %v352_v0  ;;  %239 = vmatprep.mubr.msk.bf16.mxu0 %vm353_vm0, %v352_v0  ;;  %67 = vst.msk [vmem:[#allocation2] sm:$0xff] %vm66_vm1, %v352_v0  ;;  %v71_v1 = vld [vmem:[#allocation6] sm:$0xf]  ;;  %v68_v2 = vld [vmem:[%s416_s2] sm:$0x3]  ;;  %vm72_vm3 = vcmask 64512  }
  0x27   :  { %243 = vmatprep.subr.bf16.mxu1 %v352_v0  ;;  %247 = vmatprep.mubr.msk.bf16.mxu1 %vm353_vm0, %v352_v0  ;;  %v78_v3 = vsel %vm76_vm2, %v71_v1, 0  ;;  %v69_v4 = vunpack.c.l.s8.bf16 %v68_v2  ;;  %v259_v5 = vld [vmem:[#allocation8 + $0x8] sm:$0xff]   ;;  %v260_v6 = vld [vmem:[#allocation8] sm:$0xff]   ;;  %v127_v12 = vld [vmem:[#allocation3] sm:$0xf]  ;;  %s354_s16 = smov [#allocation9]  }
  0x28   :  { %238 = vmatpush3.bf16.msra.mxu0 %v78_v3  ;;  %244 = vmatpush3.bf16.msra.mxu1 %v259_v5  ;;  %v128_v14 = vunpack.c.l.bf16 %v127_v12  ;;  %v227_v16 = vld [vmem:[%s417_s3] ss:$0 sm:$0xff]  ;;  %s216_s17 = sshll.u32 %s354_s16, 4  ;;  %vm208_vm4 = vcmask 257024   ;;  %s217_s17 = int_to_ptr.vmem [resolvable:$true] %s216_s17 }
  0x29   :  { %245 = vmatprep.subr.bf16.mxu1 %v352_v0  ;;  %v228_v21 = vld [vmem:[%s419_s5] ss:$0 sm:$0xff]  ;;  %s321_s3 = scalar_lea.vmem %s217_s17, 64  ;;  %p326_p2 = scmp.lt.s32.totalorder %s217_s17, %s217_s17 }
  0x2a   :  { %p322_p1 = scmp.ne.s32.totalorder %s217_s17, %s321_s3  ;;  %p327_p3 = scmp.lt.s32.totalorder %s321_s3, %s321_s3 }
  0x2b   :  { %240 = vmatmul.mubr.msk.bf16.vlgmr.msra.gmra.mxu0 %vm72_vm3, %v69_v4 }
  0x2c   :  { %246 = vmatpush3.bf16.msra.mxu1 %v260_v6  ;;  %p328_p4 = por %p327_p3, %p326_p2 }
  0x2d   :  { %v70_v7 = vld [vmem:[#allocation2] sm:$0xff] }
  0x2e   :  { %p329_p5 = pnand %p328_p4, %p322_p1 }
  0xeb   :  { %v114_v8 = vpop.f32.mrf.mxu0 }
  0xec   :  { %v120_v9 = vadd.f32 %v114_v8, %v70_v7 }
  0xed   :  { %v241_v10 = vpop.f32.mrf.mxu0 }
  0xee   :  { %122 = vst.msk [vmem:[#allocation2] sm:$0xff] %vm66_vm1, %v120_v9 }
  0xef   :  { %v117_v11 = vpop.f32.mrf.mxu0 }
  0xf1   :  { %v242_v13 = vpop.f32.mrf.mxu0 }
  0xf5   :  { %v126_v15 = vld [vmem:[#allocation2] sm:$0xff] }
  0xf6   :  { %v129_v17 = vadd.f32 %v128_v14, %v126_v15 }
  0xf8   :  { %v137_v18 = vadd.f32 %v227_v16, %v129_v17 }
  0xfa   :  { %v138_v19 = vmax.f32 %v137_v18, 0.0 }
  0xfc   :  { %v139_v20 = vpack.c.bf16 %v138_v19, %v138_v19 }
  0xfe   :  { %248 = vmatmul.mubr.msk.bf16.vlgmr.msra.gmra.mxu1 %vm66_vm1, %v139_v20 }
 0x1be   :  { %v200_v22 = vpop.f32.mrf.mxu1 }
 0x1bf   :  { %v201_v23 = vadd.f32 %v228_v21, %v200_v22 }
 0x1c0   :  { %v249_v24 = vpop.f32.mrf.mxu1 }
 0x1c1   :  { %v206_v25 = vmax.f32 %v201_v23, 0.0 }
 0x1c2   :  { %v203_v26 = vpop.f32.mrf.mxu1 }
 0x1c3   :  { %v207_v27 = vpack.c.bf16 %v206_v25, %v206_v25 }
 0x1c4   :  { %v250_v28 = vpop.f32.mrf.mxu1 }
 0x1c5   :  { %209 = vst.msk [vmem:[#allocation9] sm:$0xf] %vm208_vm4, %v207_v27 }
 0x1c6   :  { %332 = shalt.err (!%p329_p5)
}
 0x1c7   :  { %219 = dma.vmem_to_hbm [thread:$0]  %s217_s17, 64, %s420_s6, [#allocation5]  }
 0x1c8   :  { %345 = dma.done.wait [#allocation5], 64  }
 0x1c9   :  { %346 = vsyncadd [#allocation5], 4294967232 }
 0x1ca   :  { %223 = vsyncpa [#allocation4], 1 }
 0x1cb   :  { %224 = vsyncpa [#allocation7], 1 }
 0x1cc   :  { %225 = vsyncpa [#allocation5], 1 }

</bundles_post_ra>
